<compile_context>
chip_gen: v5e
topology: v5e:2x2
jax: 0.10.0
libtpu: 0.0.40
codegen_flags: <defaults>
</compile_context>

<pallas_src>
import functools
import math

import jax
import jax.numpy as jnp
from jax.experimental import pallas as pl
from jax.experimental.pallas import tpu as pltpu


def _sdpa_kernel(*refs, sm_scale, has_mask):
    if has_mask:
        q_ref, k_ref, v_ref, mask_ref, o_ref, s_ref = refs
    else:
        q_ref, k_ref, v_ref, o_ref, s_ref = refs

    q = q_ref[0]          # (H, tq, D)
    k = k_ref[0]          # (H, L,  D)
    v = v_ref[0]          # (H, L,  D)

    # Batched over heads; contraction is on the last dims of both operands, so no
    # explicit k.T / XLU relayout is needed.  Accumulate in f32 on the MXU.
    scores = jnp.einsum("hqd,hkd->hqk", q, k,
                        preferred_element_type=jnp.float32) * sm_scale

    if has_mask:
        scores = jnp.where(mask_ref[0] == 0, -1000.0, scores)

    # Numerically-stable softmax.
    m = jnp.max(scores, axis=-1, keepdims=True)
    p = jnp.exp(scores - m)
    l = jnp.sum(p, axis=-1, keepdims=True)
    # EUP approximate reciprocal + one Newton step -> f32-accurate 1/l without a
    # full-latency divide on the VPU critical path.
    r = pl.reciprocal(l, approx=True)
    r = r * (2.0 - l * r)
    p = p * r

    s_ref[0] = p.astype(s_ref.dtype)
    o_ref[0] = jnp.einsum("hqk,hkd->hqd", p, v,
                          preferred_element_type=jnp.float32).astype(o_ref.dtype)


def scale_dot_product_attention(q, k, v, mask=None, *, q_tile=128):
    """q, k, v: (B, H, L, D). mask: optional, broadcastable to (B, H, L, L).

    Returns (out (B,H,L,D), score (B,H,L,L)) — same as the PyTorch module.
    """
    B, H, L, D = q.shape
    sm_scale = 1.0 / math.sqrt(D)

    # Query tiling: bound VMEM per grid step for long sequences; tq must tile L.
    if L > q_tile and L % q_tile == 0:
        tq = q_tile
    else:
        tq = L
    num_q = L // tq

    has_mask = mask is not None
    kernel = functools.partial(_sdpa_kernel, sm_scale=sm_scale, has_mask=has_mask)

    q_spec = pl.BlockSpec((1, H, tq, D), lambda b, qi: (b, 0, qi, 0))
    kv_spec = pl.BlockSpec((1, H, L, D), lambda b, qi: (b, 0, 0, 0))
    o_spec = pl.BlockSpec((1, H, tq, D), lambda b, qi: (b, 0, qi, 0))
    s_spec = pl.BlockSpec((1, H, tq, L), lambda b, qi: (b, 0, qi, 0))

    in_specs = [q_spec, kv_spec, kv_spec]
    inputs = [q, k, v]
    if has_mask:
        mask_b = jnp.broadcast_to(mask, (B, H, L, L)).astype(jnp.int32)
        in_specs.append(pl.BlockSpec((1, H, tq, L), lambda b, qi: (b, 0, qi, 0)))
        inputs.append(mask_b)

    # Advisory cost estimate for XLA scheduling around the custom call.
    flops = 4 * B * H * L * L * D                       # QK^T + PV
    transcendentals = B * H * L * L                     # exp
    bytes_accessed = 4 * (3 * B * H * L * D             # q, k, v
                          + B * H * L * D               # out
                          + B * H * L * L               # score
                          + (B * H * L * L if has_mask else 0))
    cost = pl.CostEstimate(flops=flops,
                           transcendentals=transcendentals,
                           bytes_accessed=bytes_accessed)

    # VMEM budget: every block is double-buffered by default.  Clamp to 48 MiB so
    # the limit stays legal on v7x (64 MiB physical per TensorCore).
    block_bytes = 4 * (H * tq * D            # q
                       + 2 * H * L * D       # k, v
                       + H * tq * D          # out
                       + H * tq * L          # score
                       + (H * tq * L if has_mask else 0))
    vmem_limit = min(max(2 * block_bytes + (4 << 20), 32 << 20), 48 << 20)

    out, score = pl.pallas_call(
        kernel,
        out_shape=(jax.ShapeDtypeStruct((B, H, L, D), q.dtype),
                   jax.ShapeDtypeStruct((B, H, L, L), q.dtype)),
        grid_spec=pltpu.PrefetchScalarGridSpec(
            num_scalar_prefetch=0,
            grid=(B, num_q),
            in_specs=in_specs,
            out_specs=(o_spec, s_spec),
        ),
        compiler_params=pltpu.CompilerParams(
            dimension_semantics=("parallel", "parallel"),
            vmem_limit_bytes=vmem_limit),
        cost_estimate=cost,
    )(*inputs)
    return out, score


def reference_sdpa(q, k, v, mask=None):
    """Pure-JAX reference mirroring the PyTorch module (f32-accurate matmuls)."""
    D = q.shape[-1]
    score = jnp.einsum("bhqd,bhkd->bhqk", q, k,
                       precision=jax.lax.Precision.HIGHEST) / math.sqrt(D)
    if mask is not None:
        score = jnp.where(mask == 0, -1000.0, score)
    p = jax.nn.softmax(score, axis=-1)
    out = jnp.einsum("bhqk,bhkd->bhqd", p, v,
                     precision=jax.lax.Precision.HIGHEST)
    return out, p


if __name__ == "__main__":
    B, H, L, D = 2, 4, 8, 32

    key = jax.random.PRNGKey(0)
    kq, kk, kv, km = jax.random.split(key, 4)
    q = jax.random.normal(kq, (B, H, L, D), jnp.float32)
    k = jax.random.normal(kk, (B, H, L, D), jnp.float32)
    v = jax.random.normal(kv, (B, H, L, D), jnp.float32)

    TOL = 2e-2  # covers any bf16 matmul-pass difference between XLA and Mosaic

    # Unmasked path.
    out, score = scale_dot_product_attention(q, k, v)
    out, score = jax.block_until_ready((out, score))
    ref_out, ref_score = reference_sdpa(q, k, v)
    assert out.shape == (B, H, L, D) and score.shape == (B, H, L, L)
    assert jnp.allclose(out, ref_out, atol=TOL, rtol=TOL), "out mismatch"
    assert jnp.allclose(score, ref_score, atol=TOL, rtol=TOL), "score mismatch"

    # Masked path (mask broadcast over heads, masked_fill(mask==0, -1000)).
    mask = (jax.random.uniform(km, (B, 1, L, L)) > 0.3).astype(jnp.int32)
    out_m, score_m = scale_dot_product_attention(q, k, v, mask=mask)
    out_m, score_m = jax.block_until_ready((out_m, score_m))
    ref_out_m, ref_score_m = reference_sdpa(q, k, v, mask=mask)
    assert jnp.allclose(out_m, ref_out_m, atol=TOL, rtol=TOL), "masked out mismatch"
    assert jnp.allclose(score_m, ref_score_m, atol=TOL, rtol=TOL), "masked score mismatch"

    print("KERNEL_OK")
</pallas_src>

<mosaic_0001>
module attributes {stable_mosaic.version = 11 : i64} {
  func.func @_sdpa_kernel(%arg0: i32, %arg1: i32, %arg2: memref<1x4x8x32xf32, #tpu.memory_space<vmem>>, %arg3: memref<1x4x8x32xf32, #tpu.memory_space<vmem>>, %arg4: memref<1x4x8x32xf32, #tpu.memory_space<vmem>>, %arg5: memref<1x4x8x32xf32, #tpu.memory_space<vmem>>, %arg6: memref<1x4x8x8xf32, #tpu.memory_space<vmem>>) attributes {dimension_semantics = [#tpu.dimension_semantics<parallel>, #tpu.dimension_semantics<parallel>], iteration_bounds = array<i64: 2, 1>, scalar_prefetch = 0 : i64, scratch_operands = 0 : i64, tpu.core_type = #tpu.core_type<tc>, window_params = [{transform_indices = @transform_0, window_bounds = array<i64: 1, 4, 8, 32>}, {transform_indices = @transform_1, window_bounds = array<i64: 1, 4, 8, 32>}, {transform_indices = @transform_2, window_bounds = array<i64: 1, 4, 8, 32>}, {transform_indices = @transform_3, window_bounds = array<i64: 1, 4, 8, 32>}, {transform_indices = @transform_4, window_bounds = array<i64: 1, 4, 8, 8>}]} {
    %c0 = arith.constant 0 : index
    %c0_0 = arith.constant 0 : index
    %c0_1 = arith.constant 0 : index
    %c0_2 = arith.constant 0 : index
    %0 = vector.load %arg2[%c0, %c0_0, %c0_1, %c0_2] : memref<1x4x8x32xf32, #tpu.memory_space<vmem>>, vector<1x4x8x32xf32>
    %1 = vector.shape_cast %0 : vector<1x4x8x32xf32> to vector<4x8x32xf32>
    %c0_3 = arith.constant 0 : index
    %c0_4 = arith.constant 0 : index
    %c0_5 = arith.constant 0 : index
    %c0_6 = arith.constant 0 : index
    %2 = vector.load %arg3[%c0_3, %c0_4, %c0_5, %c0_6] : memref<1x4x8x32xf32, #tpu.memory_space<vmem>>, vector<1x4x8x32xf32>
    %3 = vector.shape_cast %2 : vector<1x4x8x32xf32> to vector<4x8x32xf32>
    %c0_7 = arith.constant 0 : index
    %c0_8 = arith.constant 0 : index
    %c0_9 = arith.constant 0 : index
    %c0_10 = arith.constant 0 : index
    %4 = vector.load %arg4[%c0_7, %c0_8, %c0_9, %c0_10] : memref<1x4x8x32xf32, #tpu.memory_space<vmem>>, vector<1x4x8x32xf32>
    %5 = vector.shape_cast %4 : vector<1x4x8x32xf32> to vector<4x8x32xf32>
    "tpu.trace_start"() <{level = 10 : i32, message = "hqd,hkd->hqk"}> : () -> ()
    %cst = arith.constant dense<0.000000e+00> : vector<4x8x8xf32>
    %6 = tpu.matmul %1, %3, %cst {dimension_numbers = #tpu.dot_dimension_numbers<[2], [2], [1], [1], [0, 0, 0, 1, 1, 1], [0], [0]>} : vector<4x8x32xf32>, vector<4x8x32xf32>, vector<4x8x8xf32> -> vector<4x8x8xf32>
    "tpu.trace_stop"() : () -> ()
    %cst_11 = arith.constant 0.176776692 : f32
    %7 = vector.broadcast %cst_11 : f32 to vector<4x8x8xf32>
    %8 = arith.mulf %6, %7 : vector<4x8x8xf32>
    %cst_12 = arith.constant dense<0xFF800000> : vector<4x8xf32>
    %9 = vector.multi_reduction <maximumf>, %8, %cst_12 [2] : vector<4x8x8xf32> to vector<4x8xf32>
    %10 = vector.shape_cast %9 : vector<4x8xf32> to vector<4x8x1xf32>
    %11 = vector.broadcast %10 : vector<4x8x1xf32> to vector<4x8x8xf32>
    %12 = arith.subf %8, %11 : vector<4x8x8xf32>
    %13 = math.exp %12 : vector<4x8x8xf32>
    %cst_13 = arith.constant dense<0.000000e+00> : vector<4x8xf32>
    %14 = vector.multi_reduction <add>, %13, %cst_13 [2] : vector<4x8x8xf32> to vector<4x8xf32>
    %15 = vector.shape_cast %14 : vector<4x8xf32> to vector<4x8x1xf32>
    %16 = tpu.reciprocal %15 {approx = true} : vector<4x8x1xf32> -> vector<4x8x1xf32>
    %17 = arith.mulf %15, %16 : vector<4x8x1xf32>
    %cst_14 = arith.constant 2.000000e+00 : f32
    %18 = vector.broadcast %cst_14 : f32 to vector<4x8x1xf32>
    %19 = arith.subf %18, %17 : vector<4x8x1xf32>
    %20 = arith.mulf %16, %19 : vector<4x8x1xf32>
    %21 = vector.broadcast %20 : vector<4x8x1xf32> to vector<4x8x8xf32>
    %22 = arith.mulf %13, %21 : vector<4x8x8xf32>
    %c0_15 = arith.constant 0 : index
    %c0_16 = arith.constant 0 : index
    %c0_17 = arith.constant 0 : index
    %c0_18 = arith.constant 0 : index
    %23 = vector.load %arg6[%c0_15, %c0_16, %c0_17, %c0_18] : memref<1x4x8x8xf32, #tpu.memory_space<vmem>>, vector<1x4x8x8xf32>
    %24 = vector.shape_cast %23 : vector<1x4x8x8xf32> to vector<4x8x8xf32>
    %25 = vector.shape_cast %22 : vector<4x8x8xf32> to vector<1x4x8x8xf32>
    tpu.vector_store %arg6[%c0_15, %c0_16, %c0_17, %c0_18], %25 {strides = array<i32>} : memref<1x4x8x8xf32, #tpu.memory_space<vmem>>, vector<1x4x8x8xf32>,
    "tpu.trace_start"() <{level = 10 : i32, message = "hqk,hkd->hqd"}> : () -> ()
    %cst_19 = arith.constant dense<0.000000e+00> : vector<4x8x32xf32>
    %26 = tpu.matmul %22, %5, %cst_19 {dimension_numbers = #tpu.dot_dimension_numbers<[2], [1], [1], [2], [0, 0, 0, 1, 1, 2], [0], [0]>} : vector<4x8x8xf32>, vector<4x8x32xf32>, vector<4x8x32xf32> -> vector<4x8x32xf32>
    "tpu.trace_stop"() : () -> ()
    %c0_20 = arith.constant 0 : index
    %c0_21 = arith.constant 0 : index
    %c0_22 = arith.constant 0 : index
    %c0_23 = arith.constant 0 : index
    %27 = vector.load %arg5[%c0_20, %c0_21, %c0_22, %c0_23] : memref<1x4x8x32xf32, #tpu.memory_space<vmem>>, vector<1x4x8x32xf32>
    %28 = vector.shape_cast %27 : vector<1x4x8x32xf32> to vector<4x8x32xf32>
    %29 = vector.shape_cast %26 : vector<4x8x32xf32> to vector<1x4x8x32xf32>
    tpu.vector_store %arg5[%c0_20, %c0_21, %c0_22, %c0_23], %29 {strides = array<i32>} : memref<1x4x8x32xf32, #tpu.memory_space<vmem>>, vector<1x4x8x32xf32>,
    return
  }
  func.func @transform_0(%arg0: i32, %arg1: i32) -> (i32, i32, i32, i32) {
    %c0_i32 = arith.constant 0 : i32
    %c0_i32_0 = arith.constant 0 : i32
    %c0_i32_1 = arith.constant 0 : i32
    return %arg0, %c0_i32, %arg1, %c0_i32_0 : i32, i32, i32, i32
  }
  func.func @transform_1(%arg0: i32, %arg1: i32) -> (i32, i32, i32, i32) {
    %c0_i32 = arith.constant 0 : i32
    %c0_i32_0 = arith.constant 0 : i32
    %c0_i32_1 = arith.constant 0 : i32
    %c0_i32_2 = arith.constant 0 : i32
    return %arg0, %c0_i32, %c0_i32_0, %c0_i32_1 : i32, i32, i32, i32
  }
  func.func @transform_2(%arg0: i32, %arg1: i32) -> (i32, i32, i32, i32) {
    %c0_i32 = arith.constant 0 : i32
    %c0_i32_0 = arith.constant 0 : i32
    %c0_i32_1 = arith.constant 0 : i32
    %c0_i32_2 = arith.constant 0 : i32
    return %arg0, %c0_i32, %c0_i32_0, %c0_i32_1 : i32, i32, i32, i32
  }
  func.func @transform_3(%arg0: i32, %arg1: i32) -> (i32, i32, i32, i32) {
    %c0_i32 = arith.constant 0 : i32
    %c0_i32_0 = arith.constant 0 : i32
    %c0_i32_1 = arith.constant 0 : i32
    return %arg0, %c0_i32, %arg1, %c0_i32_0 : i32, i32, i32, i32
  }
  func.func @transform_4(%arg0: i32, %arg1: i32) -> (i32, i32, i32, i32) {
    %c0_i32 = arith.constant 0 : i32
    %c0_i32_0 = arith.constant 0 : i32
    %c0_i32_1 = arith.constant 0 : i32
    return %arg0, %c0_i32, %arg1, %c0_i32_0 : i32, i32, i32, i32
  }
}

</mosaic_0001>

<bundles_post_ra>
// kernel: tpu_custom_call.1
= control target key start
LH: loop header
LB: loop body
LE: loop exit
PB: predicated region body
PF: predicated region fallthrough
CT: control target
= control target key end

     0   :  { %s1406_s0 = inlined_call_operand.hbm [shape: f32[2,4,8,32], index: 0, kind: input, shape index: {}]   ;;  %s1407_s1 = inlined_call_operand.hbm [shape: f32[2,4,8,32], index: 1, kind: input, shape index: {}]   ;;  %s1408_s2 = inlined_call_operand.hbm [shape: f32[2,4,8,32], index: 2, kind: input, shape index: {}]   ;;  %s1409_s3 = inlined_call_operand.hbm [shape: f32[2,4,8,32], index: 3, kind: output, shape index: {0}]   ;;  %s1410_s4 = inlined_call_operand.hbm [shape: f32[2,4,8,8], index: 4, kind: output, shape index: {1}]  }
   0x1   :  { %1417 = sst [smem:[#allocation21_spill]] %s1407_s1 }
   0x2   :  { %10 = vsyncpa [#allocation3], 0 }
   0x3   :  { %12 = vsyncpa [#allocation3 + $0x1], 0 }
   0x4   :  { %13 = vsyncpa [#allocation6], 0 }
   0x5   :  { %15 = vsyncpa [#allocation6 + $0x1], 0 }
   0x6   :  { %16 = vsyncpa [#allocation4], 0 }
   0x7   :  { %18 = vsyncpa [#allocation4 + $0x1], 0 }
   0x8   :  { %19 = vsyncpa [#allocation10], 0 }
   0x9   :  { %21 = vsyncpa [#allocation10 + $0x1], 0  ;;  %s1190_s15 = smov 0   ;;  %s1192_s16 = smov 0  }
   0xa   :  { %s1194_s17 = smov 0   ;;  %s1196_s18 = smov 0  }
   0xb   :  { %s1198_s19 = smov 0   ;;  %s1200_s20 = smov 0  }
   0xc LB: > { %1418 = sst [smem:[#allocation15_spill]] %s1147_s17  ;;  %s1221_s21 = sadd.s32 4294967295, %s1159_s20   ;;  %s1159_s20 = sphi %s1200_s20, %s27_s20   ;;  %s1155_s19 = sphi %s1198_s19, %s1436_s19   ;;  %s1151_s18 = sphi %s1196_s18, %s1435_s18   ;;  %s1147_s17 = sphi %s1194_s17, %s1434_s17   ;;  %s1143_s16 = sphi %s1192_s16, %s1438_s16   ;;  %s1139_s15 = sphi %s1190_s15, %s1437_s15  }
   0xd   : > { %1419 = sst [smem:[#allocation16_spill]] %s1155_s19  ;;  %s811_s22 = sadd.s32 4294967294, %s1159_s20  }
   0xe   : > { %1420 = sst [smem:[#allocation17_spill]] %s1159_s20  ;;  %s39_s23 = sadd.s32 1, %s1155_s19 }
   0xf   : > { %s48_s24 = sadd.s32 1, %s1147_s17  ;;  %p41_p0 = scmp.ge.s32.totalorder %s39_s23, 2 }
  0x10   : > { %p55_p1 = scmp.ne.s32.totalorder %s1147_s17, %s1143_s16  ;;  %p56_p2 = scmp.eq.s32.totalorder %s1159_s20, 0 }
  0x11   : > { %p61_p3 = scmp.ne.s32.totalorder %s1143_s16, %s1139_s15  ;;  %s1440_s23 = smov (%p41_p0, %s39_s23), 0 }
  0x12   : > { %1421 = sst [smem:[#allocation18_spill]] %s1440_s23  ;;  %p1233_p4 = por %p56_p2, %p55_p1 }
  0x13   : > { %p62_p5 = scmp.eq.s32.totalorder %s1221_s21, 0  ;;  %s43_s26 = ssub.s32 %s1155_s19, %s1440_s23 }
  0x14   : > { %p139_p6 = scmp.eq.s32.totalorder %s1221_s21, 1  ;;  %p46_p7 = scmp.eq.s32.totalorder %s43_s26, 0 }
  0x15   : > { %p1241_p8 = por %p62_p5, %p61_p3  ;;  %p145_p10 = scmp.eq.s32.totalorder %s811_s22, 1 }
  0x16   : > { %p1245_p9 = por %p139_p6, %p55_p1  ;;  %p813_p12 = scmp.ge.s32.totalorder %s1159_s20, 2 }
  0x17   : > { %s1250_s29 = scalar_select %p46_p7, %s1147_s17, %s48_s24  }
  0x18   : > { %p1252_p11 = por %p145_p10, %p61_p3  ;;  %p881_p13 = scmp.lt.s32.totalorder %s1159_s20, 2 }
  0x19   : > { %1425 = sst [smem:[#allocation19_spill]] %s1250_s29  ;;  %s193_s5 = sand.u32 1, %s1147_s17  }
  0x1a   : > { %s1426_s30 = scalar_select %p1252_p11, 1, 0 }
  0x1b   : > { %s1259_s6 = sshll.u32 %s193_s5, 5  ;;  %s849_s7 = sshll.u32 %s1155_s19, 5 }
  0x1c   : > { %1427 = sst [smem:[#allocation20_spill]] %s1426_s30  ;;  %p1264_p0 = pnand %p881_p13, %p1233_p4 }
  0x1d   : > { %s216_s9 = sand.u32 1, %s1159_s20   ;;  %s1429_s1 = sld [smem:[#allocation21_spill]] }
  0x1e   : > { %s220_s14 = scalar_lea.vmem [#allocation5], %s1259_s6  ;;  %s217_s24 = scalar_lea.sflag [#allocation6], %s216_s9 }
  0x1f   : > { %s228_s22 = sshll.u32 %s220_s14, 4  ;;  %s1161_s26 = smov 128   ;;  %s229_s22 = int_to_ptr.vmem [resolvable:$true] %s228_s22 }
  0x20   : > { %s1162_s25 = smov 8   ;;  %p823_p1 = scmp.ge.s32.totalorder %s1159_s20, 1 }
  0x21   : > { %p258_p2 = scmp.lt.s32.totalorder %s1159_s20, 3  ;;  %s194_s9 = scalar_lea.sflag [#allocation3], %s193_s5 }
  0x22   : > { %s247_s29 = scalar_lea.hbm %s1408_s2, %s849_s7  ;;  %s242_s20 = scalar_lea.vmem [#allocation7], %s1259_s6 }
  0x23   : > { %s225_s12 = scalar_lea.hbm %s1429_s1, %s849_s7  ;;  %p1277_p3 = pnand %p823_p1, %p258_p2 }
  0x24   : > { %s226_s13 = sshll.u32 %s225_s12, 4  ;;  %s203_s12 = scalar_lea.hbm %s1406_s0, %s849_s7  ;;  %s227_s13 = int_to_ptr.hbm [resolvable:$true] %s226_s13 }
  0x25   : > { %870 = dma.hbm_to_vmem [thread:$0]  (!%p1264_p0), %s227_s13, 512, %s229_s22, %s217_s24, %s1161_s26, %s1161_s26, %s1162_s25  }
  0x26   : > { %s204_s14 = sshll.u32 %s203_s12, 4  ;;  %s197_s1 = scalar_lea.vmem [#allocation2], %s1259_s6  ;;  %s205_s14 = int_to_ptr.hbm [resolvable:$true] %s204_s14 }
  0x27   : > { %s206_s19 = sshll.u32 %s197_s1, 4  ;;  %s248_s17 = sshll.u32 %s247_s29, 4  ;;  %s207_s19 = int_to_ptr.vmem [resolvable:$true] %s206_s19  ;;  %s249_s17 = int_to_ptr.hbm [resolvable:$true] %s248_s17 }
  0x28   : > { %867 = dma.hbm_to_vmem [thread:$0]  (!%p1264_p0), %s205_s14, 512, %s207_s19, %s194_s9, %s1161_s26, %s1161_s26, %s1162_s25  }
  0x29   : > { %s250_s30 = sshll.u32 %s242_s20, 4  ;;  %262 = sbr.rel (%p1277_p3) target bundleno = 591 (0x24f), region = 32  ;;  %s251_s30 = int_to_ptr.vmem [resolvable:$true] %s250_s30 }
  0x2a   : > { %873 = dma.hbm_to_vmem [thread:$0]  (!%p1264_p0), %s249_s17, 512, %s251_s30, %s217_s24, %s1161_s26, %s1161_s26, %s1162_s25  }
  0x2b   : > { %s1296_s1 = sand.u32 (!%p1277_p3), 1, %s1143_s16  }
  0x2c   : > { %s1299_s19 = sshll.u32 (!%p1277_p3), %s1296_s1, 5  ;;  %s265_s5 = scalar_lea.sflag (!%p1277_p3), [#allocation3], %s1296_s1 }
  0x2d   : > { %s268_s29 = scalar_lea.vmem (!%p1277_p3), [#allocation2], %s1299_s19 }
  0x2e   : > { %1122 = dma.done.wait (%p1241_p8), %s265_s5, 512  }
  0x2f   : > { %1124 = vsyncadd (%p1241_p8), %s265_s5, 4294966784  ;;  %s274_s17 = sand.u32 1, %s1221_s21   ;;  %s278_s23 = scalar_lea.vmem [#allocation5], %s1299_s19 }
  0x30   : > { %s275_s20 = scalar_lea.sflag [#allocation6], %s274_s17 }
  0x31   : > { %1126 = dma.done.wait (%p1241_p8), %s275_s20, 1024  }
  0x32   : > { %1128 = vsyncadd (%p1241_p8), %s275_s20, 4294966272  ;;  %vm341_vm0 = vcmask 261120   ;;  %v333_v0 = vld [vmem:[%s278_s23] sm:$0xff]  ;;  %v335_v1 = vld [vmem:[%s278_s23 + $0x10] sm:$0xff]  ;;  %vm450_vm1 = vcmask 64512   ;;  %s288_s21 = scalar_lea.vmem [#allocation7], %s1299_s19 }
  0x33   : > { %v329_v2 = vld [vmem:[%s268_s29] sm:$0xff]  ;;  %829 = vmatpush.xpose.msk.msra.mxu0 %vm341_vm0, %v333_v0  ;;  %833 = vmatpush.xpose.msk.msra.mxu2 %vm341_vm0, %v335_v1  ;;  %v331_v3 = vld [vmem:[%s268_s29 + $0x10] sm:$0xff]  ;;  %v334_v4 = vld [vmem:[%s278_s23 + $0x8] sm:$0xff]  ;;  %s328_s27 = scalar_lea.vmem [#allocation9], %s1299_s19  ;;  %s852_s30 = sshll.u32 %s1151_s18, 5 }
  0x34   : > { %v336_v5 = vld [vmem:[%s278_s23 + $0x18] sm:$0xff]  ;;  %831 = vmatpush.xpose.msk.msra.mxu1 %vm341_vm0, %v334_v4  ;;  %v330_v6 = vld [vmem:[%s268_s29 + $0x8] sm:$0xff]  ;;  %v337_v40 = vld [vmem:[%s288_s21] sm:$0xff]  ;;  %s644_s6 = sshll.u32 %s328_s27, 4  ;;  %s643_s24 = scalar_lea.hbm %s1410_s4, %s852_s30  ;;  %s645_s6 = int_to_ptr.vmem [resolvable:$true] %s644_s6 }
  0x35   : > { %835 = vmatpush.xpose.msk.msra.mxu3 %vm341_vm0, %v336_v5  ;;  %v332_v7 = vld [vmem:[%s268_s29 + $0x18] sm:$0xff]  ;;  %v339_v41 = vld [vmem:[%s288_s21 + $0x10] sm:$0xff]  ;;  %v338_v42 = vld [vmem:[%s288_s21 + $0x8] sm:$0xff]  ;;  %s646_s26 = sshll.u32 %s643_s24, 4  ;;  %s613_s25 = scalar_lea.sflag [#allocation10], %s1296_s1  ;;  %s647_s26 = int_to_ptr.hbm [resolvable:$true] %s646_s26 }
  0x36   : > { %830 = vmatmul.msk.f32.vlgmr.msra.gmra.mxu0 %vm341_vm0, %v329_v2  ;;  %834 = vmatmul.msk.f32.vlgmr.msra.gmra.mxu2 %vm341_vm0, %v331_v3  ;;  %v340_v43 = vld [vmem:[%s288_s21 + $0x18] sm:$0xff]  ;;  %s1055_s10 = sshra.s32 %s647_s26, 4  ;;  %s1061_s9 = scalar_lea.hbm %s1410_s4, 64  ;;  %s1056_s10 = int_to_ptr.hbm [resolvable:$true] %s1055_s10 }
  0x37   : > { %832 = vmatmul.msk.f32.vlgmr.msra.gmra.mxu1 %vm341_vm0, %v330_v6  ;;  %529 = vmatpush.msrb.mxu0 %v337_v40  ;;  %s1057_s11 = scalar_lea.hbm %s1056_s10, 32  ;;  %p1062_p7 = scmp.lt.s32.totalorder %s1056_s10, %s1410_s4 }
  0x38   : > { %836 = vmatmul.msk.f32.vlgmr.msra.gmra.mxu3 %vm341_vm0, %v332_v7  ;;  %575 = vmatpush.msrb.mxu2 %v339_v41  ;;  %p1058_p4 = scmp.ne.s32.totalorder %s1056_s10, %s1057_s11  ;;  %p1063_p8 = scmp.lt.s32.totalorder %s1061_s9, %s1057_s11 }
  0x39   : > { %552 = vmatpush.msrb.mxu1 %v338_v42  ;;  %598 = vmatpush.msrb.mxu3 %v340_v43 }
  0x3a   : > { %p1059_p5 = pnand %p1058_p4, %p1245_p9  ;;  %p1064_p10 = por %p1063_p8, %p1062_p7 }
  0x3c   : > { %p1060_p6 = pneg %p1059_p5 }
  0x3e   : > { %p1065_p13 = pnand %p1064_p10, %p1060_p6 }
  0xb3   : > { %v365_v8 = vpop.f32.mrf.mxu0 }
  0xb4   : > { %v446_v9 = vmul.f32 0.17677669, %v365_v8  ;;  %v391_v10 = vpop.f32.mrf.mxu1 }
  0xb5   : > { %v447_v12 = vmul.f32 0.17677669, %v391_v10 }
  0xb6   : > { %v451_v11 = vsel %vm450_vm1, %v446_v9, -inf }
  0xb7   : > { %452 = vmax.xlane.f32.xlu1 %v451_v11  ;;  %v454_v17 = vsel %vm450_vm1, %v447_v12, -inf }
  0xb9   : > { %v417_v13 = vpop.f32.mrf.mxu2 }
  0xba   : > { %v448_v14 = vmul.f32 0.17677669, %v417_v13 }
  0xbb   : > { %v443_v15 = vpop.f32.mrf.mxu3 }
  0xbc   : > { %v457_v16 = vsel %vm450_vm1, %v448_v14, -inf  ;;  %v449_v18 = vmul.f32 0.17677669, %v443_v15 }
  0xbd   : > { %458 = vmax.xlane.f32.xlu0 %v457_v16 }
  0xbe   : > { %v460_v19 = vsel %vm450_vm1, %v449_v18, -inf }
  0xbf   : > { %455 = vmax.xlane.f32.xlu1 %v454_v17 }
  0xc5   : > { %461 = vmax.xlane.f32.xlu0 %v460_v19 }
 0x12a   : > { %v453_v20 = vpop.xlane.xlu1 %452 }
 0x12b   : > { %v463_v21 = vsub.f32 %v446_v9, %v453_v20 }
 0x12d   : > { %v467_v22 = vmul.f32 1.442695, %v463_v21 }
 0x12f   : > { %935 = vpow2.f32 %v467_v22 }
 0x130   : > { %v459_v23 = vpop.xlane.xlu0 %458 }
 0x131   : > { %v465_v24 = vsub.f32 %v448_v14, %v459_v23 }
 0x132   : > { %v456_v25 = vpop.xlane.xlu1 %455 }
 0x133   : > { %v471_v26 = vmul.f32 1.442695, %v465_v24  ;;  %v464_v27 = vsub.f32 %v447_v12, %v456_v25 }
 0x135   : > { %v936_v28 = vpop.eup %935  ;;  %937 = vpow2.f32 %v471_v26  ;;  %v469_v29 = vmul.f32 1.442695, %v464_v27 }
 0x136   : > { %v475_v30 = vsel %vm450_vm1, %v936_v28, 0.0 }
 0x137   : > { %939 = vpow2.f32 %v469_v29  ;;  %476 = vadd.xlane.f32.xlu0 %v475_v30 }
 0x138   : > { %v462_v31 = vpop.xlane.xlu0 %461 }
 0x139   : > { %v466_v32 = vsub.f32 %v449_v18, %v462_v31 }
 0x13b   : > { %v938_v33 = vpop.eup %937  ;;  %v473_v34 = vmul.f32 1.442695, %v466_v32 }
 0x13c   : > { %v481_v35 = vsel %vm450_vm1, %v938_v33, 0.0 }
 0x13d   : > { %v940_v36 = vpop.eup %939  ;;  %941 = vpow2.f32 %v473_v34  ;;  %482 = vadd.xlane.f32.xlu2 %v481_v35 }
 0x13e   : > { %v478_v37 = vsel %vm450_vm1, %v940_v36, 0.0 }
 0x13f   : > { %479 = vadd.xlane.f32.xlu1 %v478_v37 }
 0x143   : > { %v942_v38 = vpop.eup %941 }
 0x144   : > { %v484_v39 = vsel %vm450_vm1, %v942_v38, 0.0 }
 0x145   : > { %485 = vadd.xlane.f32.xlu2 %v484_v39 }
 0x1aa   : > { %v477_v44 = vpop.xlane.xlu0 %476 }
 0x1ab   : > { %943 = vrcp.f32 %v477_v44 }
 0x1b0   : > { %v483_v45 = vpop.xlane.xlu2 %482 }
 0x1b1   : > { %v944_v46 = vpop.eup %943  ;;  %945 = vrcp.f32 %v483_v45 }
 0x1b2   : > { %v491_v47 = vmul.f32 %v944_v46, %v477_v44  ;;  %v480_v48 = vpop.xlane.xlu1 %479 }
 0x1b3   : > { %947 = vrcp.f32 %v480_v48 }
 0x1b4   : > { %v495_v49 = vsub.f32 2.0, %v491_v47 }
 0x1b6   : > { %v499_v50 = vmul.f32 %v944_v46, %v495_v49 }
 0x1b7   : > { %v946_v51 = vpop.eup %945 }
 0x1b8   : > { %v503_v52 = vmul.f32 %v936_v28, %v499_v50  ;;  %v493_v53 = vmul.f32 %v946_v51, %v483_v45  ;;  %v486_v54 = vpop.xlane.xlu2 %485 }
 0x1b9   : > { %v948_v55 = vpop.eup %947  ;;  %949 = vrcp.f32 %v486_v54 }
 0x1ba   : > { %507 = vst.msk [vmem:[%s328_s27] sm:$0xff] %vm450_vm1, %v503_v52  ;;  %v497_v56 = vsub.f32 2.0, %v493_v53  ;;  %v492_v57 = vmul.f32 %v948_v55, %v480_v48  ;;  %837 = vmatmul.msk.f32.vlgmr.msrb.gmra.mxu0 %vm450_vm1, %v503_v52 }
 0x1bc   : > { %v501_v58 = vmul.f32 %v946_v51, %v497_v56  ;;  %v496_v59 = vsub.f32 2.0, %v492_v57 }
 0x1be   : > { %v505_v60 = vmul.f32 %v938_v33, %v501_v58  ;;  %v500_v61 = vmul.f32 %v948_v55, %v496_v59 }
 0x1bf   : > { %v950_v62 = vpop.eup %949 }
 0x1c0   : > { %509 = vst.msk [vmem:[%s328_s27 + $0x10] sm:$0xff] %vm450_vm1, %v505_v60  ;;  %v504_v63 = vmul.f32 %v940_v36, %v500_v61  ;;  %v494_v0 = vmul.f32 %v950_v62, %v486_v54  ;;  %839 = vmatmul.msk.f32.vlgmr.msrb.gmra.mxu2 %vm450_vm1, %v505_v60 }
 0x1c2   : > { %508 = vst.msk [vmem:[%s328_s27 + $0x8] sm:$0xff] %vm450_vm1, %v504_v63  ;;  %v498_v1 = vsub.f32 2.0, %v494_v0  ;;  %838 = vmatmul.msk.f32.vlgmr.msrb.gmra.mxu1 %vm450_vm1, %v504_v63 }
 0x1c4   : > { %v502_v2 = vmul.f32 %v950_v62, %v498_v1 }
 0x1c6   : > { %v506_v3 = vmul.f32 %v942_v38, %v502_v2 }
 0x1c8   : > { %510 = vst.msk [vmem:[%s328_s27 + $0x18] sm:$0xff] %vm450_vm1, %v506_v3  ;;  %840 = vmatmul.msk.f32.vlgmr.msrb.gmra.mxu3 %vm450_vm1, %v506_v3 }
 0x1c9   : > { %1068 = shalt.err (!%p1065_p13)
}
 0x1ca   : > { %s1163_s5 = smov 128   ;;  %s1164_s29 = smov 8  }
 0x1cb   : > { %861 = dma.vmem_to_hbm [thread:$0]  (%p1245_p9), %s645_s6, 512, %s647_s26, %s613_s25, %s1163_s5, %s1163_s5, %s1164_s29  }
 0x1cc   : > { %s321_s17 = scalar_lea.vmem [#allocation8], %s1299_s19  ;;  %s625_s21 = scalar_lea.hbm %s1409_s3, %s852_s30 }
 0x1cd   : > { %s626_s27 = sshll.u32 %s321_s17, 4  ;;  %s628_s7 = sshll.u32 %s625_s21, 4  ;;  %s627_s27 = int_to_ptr.vmem [resolvable:$true] %s626_s27  ;;  %s629_s7 = int_to_ptr.hbm [resolvable:$true] %s628_s7 }
 0x1ce   : > { %s608_s19 = scalar_lea.sflag [#allocation4], %s1296_s1  ;;  %s1083_s6 = sshra.s32 %s629_s7, 4  ;;  %s1084_s6 = int_to_ptr.hbm [resolvable:$true] %s1083_s6 }
 0x1cf   : > { %s1085_s8 = scalar_lea.hbm %s1084_s6, 32  ;;  %s1089_s26 = scalar_lea.hbm %s1409_s3, 64 }
 0x1d0   : > { %p1086_p0 = scmp.ne.s32.totalorder %s1084_s6, %s1085_s8  ;;  %p1090_p3 = scmp.lt.s32.totalorder %s1084_s6, %s1409_s3 }
 0x1d1   : > { %p1091_p4 = scmp.lt.s32.totalorder %s1089_s26, %s1085_s8 }
 0x1d2   : > { %p1087_p1 = pnand %p1086_p0, %p1245_p9 }
 0x1d3   : > { %p1092_p5 = por %p1091_p4, %p1090_p3 }
 0x1d4   : > { %p1088_p2 = pneg %p1087_p1 }
 0x1d6   : > { %p1093_p6 = pnand %p1092_p5, %p1088_p2 }
 0x237   : > { %v531_v4 = vpop.f32.mrf.mxu0 }
 0x238   : > { %603 = vst.msk [vmem:[%s321_s17] sm:$0xff] %vm341_vm0, %v531_v4 }
 0x23f   : > { %v554_v5 = vpop.f32.mrf.mxu1 }
 0x240   : > { %604 = vst.msk [vmem:[%s321_s17 + $0x8] sm:$0xff] %vm341_vm0, %v554_v5 }
 0x243   : > { %v577_v6 = vpop.f32.mrf.mxu2 }
 0x244   : > { %605 = vst.msk [vmem:[%s321_s17 + $0x10] sm:$0xff] %vm341_vm0, %v577_v6 }
 0x24b   : > { %v600_v7 = vpop.f32.mrf.mxu3 }
 0x24c   : > { %606 = vst.msk [vmem:[%s321_s17 + $0x18] sm:$0xff] %vm341_vm0, %v600_v7 }
 0x24d   : > { %1096 = shalt.err (!%p1093_p6)
}
 0x24e   : > { %860 = dma.vmem_to_hbm [thread:$0]  (%p1245_p9), %s627_s27, 512, %s629_s7, %s608_s19, %s1163_s5, %s1163_s5, %s1164_s29  }
 0x24f PF: > { %s1432_s10 = sld [smem:[#allocation17_spill]]  ;;  %s661_s11 = sand.u32 1, %s1139_s15  }
 0x250   : > { %p875_p7 = pnand %p813_p12, %p1252_p11  ;;  %s662_s12 = scalar_lea.sflag [#allocation4], %s661_s11 }
 0x252   : > { %p876_p8 = pneg %p875_p7 }
 0x254   : > { %1130 = dma.done.wait (%p876_p8), %s662_s12, 512  }
 0x255   : > { %1132 = vsyncadd (%p876_p8), %s662_s12, 4294966784  ;;  %s672_s14 = scalar_lea.sflag [#allocation10], %s661_s11 }
 0x256   : > { %1134 = dma.done.wait (%p876_p8), %s672_s14, 512  }
 0x257   : > { %1136 = vsyncadd (%p876_p8), %s672_s14, 4294966784  ;;  %s27_s20 = sadd.s32 1, %s1432_s10   ;;  %s1433_s28 = sld [smem:[#allocation15_spill]] }
 0x258   : > { %p24_p10 = scmp.ge.s32.totalorder %s27_s20, 4   ;;  %s1434_s17 = sld [smem:[#allocation19_spill]] }
 0x259   : > { %s1435_s18 = sld [smem:[#allocation16_spill]]  ;;  %s1437_s15 = smov %s1143_s16 }
 0x25a   : > { %s1436_s19 = sld [smem:[#allocation18_spill]]  ;;  %26 = sbr.rel (!%p24_p10) target bundleno = 12 (0xc), region = 118 }
 0x25d   : > { %s1438_s16 = smov %s1433_s28 }
 0x25f   :  { %678 = vsyncpa [#allocation3], 1 }
 0x260   :  { %680 = vsyncpa [#allocation3 + $0x1], 1 }
 0x261   :  { %681 = vsyncpa [#allocation6], 1 }
 0x262   :  { %683 = vsyncpa [#allocation6 + $0x1], 1 }
 0x263   :  { %684 = vsyncpa [#allocation4], 1 }
 0x264   :  { %686 = vsyncpa [#allocation4 + $0x1], 1 }
 0x265   :  { %687 = vsyncpa [#allocation10], 1 }
 0x266   :  { %689 = vsyncpa [#allocation10 + $0x1], 1 }

</bundles_post_ra>
